<compile_context>
chip_gen: v7x
topology: tpu7x:2x2x1
jax: 0.10.0
libtpu: 0.0.40
codegen_flags: <defaults>
</compile_context>

<pallas_src>
import math

import jax
import jax.numpy as jnp
from jax.experimental import pallas as pl
from jax.experimental.pallas import tpu as pltpu


def _layernorm(x, gamma, beta, eps=1e-5):
    mean = jnp.mean(x, axis=-1, keepdims=True)
    var = jnp.mean((x - mean) ** 2, axis=-1, keepdims=True)
    return (x - mean) * jax.lax.rsqrt(var + eps) * gamma + beta


# --------------------------------------------------------------------------
# Kernel 1: LayerNorm1 + causal self-attention + output projection + residual
# Grid: (batch, head).  Head axis accumulates into a VMEM scratch.
# --------------------------------------------------------------------------
def _make_attn_kernel(compute_dtype):
    def kernel(x_ref, ln_g_ref, ln_b_ref,
               wq_ref, wk_ref, wv_ref,
               bq_ref, bk_ref, bv_ref,
               wo_ref, bo_ref,
               o_ref,
               ln_sc, acc_sc):
        h_id = pl.program_id(1)
        n_heads = pl.num_programs(1)

        @pl.when(h_id == 0)
        def _():
            x = x_ref[0].astype(jnp.float32)                       # (S, D)
            ln_sc[...] = _layernorm(
                x, ln_g_ref[...], ln_b_ref[...]).astype(compute_dtype)
            # residual + output-projection bias (added once)
            acc_sc[...] = x + bo_ref[...]

        ln = ln_sc[...]                                            # (S, D)

        # Per-head projections: lane-dense (D contraction), no lane slicing.
        # wq/bq were pre-scaled by 1/sqrt(d_head) in the wrapper.
        q = jnp.dot(ln, wq_ref[0], preferred_element_type=jnp.float32) + bq_ref[0]
        k = jnp.dot(ln, wk_ref[0], preferred_element_type=jnp.float32) + bk_ref[0]
        v = jnp.dot(ln, wv_ref[0], preferred_element_type=jnp.float32) + bv_ref[0]

        S = q.shape[0]
        # scores = q @ k^T without a materialized transpose.
        scores = jax.lax.dot_general(
            q.astype(compute_dtype), k.astype(compute_dtype),
            (((1,), (1,)), ((), ())),
            preferred_element_type=jnp.float32)                    # (S, S)

        # causal mask (strictly upper triangle -> -inf)
        row = jax.lax.broadcasted_iota(jnp.int32, (S, S), 0)
        col = jax.lax.broadcasted_iota(jnp.int32, (S, S), 1)
        neg_inf = jnp.float32(-jnp.inf)
        scores = jnp.where(col > row, neg_inf, scores)

        scores = scores - jnp.max(scores, axis=-1, keepdims=True)
        p = jnp.exp(scores)
        p = p * pl.reciprocal(jnp.sum(p, axis=-1, keepdims=True), approx=True)

        ctx = jnp.dot(p.astype(compute_dtype), v.astype(compute_dtype),
                      preferred_element_type=jnp.float32)          # (S, dh)
        # per-head slice of the output projection; accumulate over heads.
        o_h = jnp.dot(ctx.astype(compute_dtype), wo_ref[0],
                      preferred_element_type=jnp.float32)          # (S, D)
        acc_sc[...] += o_h

        @pl.when(h_id == n_heads - 1)
        def _():
            o_ref[0] = acc_sc[...].astype(o_ref.dtype)

    return kernel


# --------------------------------------------------------------------------
# Kernel 2: LayerNorm2 + Linear(4D) + QuickGELU + Linear(D) + residual
# Grid: row tiles of the flattened (B*S, D) activations.
# --------------------------------------------------------------------------
def _make_mlp_kernel(compute_dtype):
    def kernel(x_ref, ln_g_ref, ln_b_ref, w1_ref, b1_ref, w2_ref, b2_ref,
               o_ref):
        x = x_ref[...].astype(jnp.float32)                         # (T, D)
        ln = _layernorm(x, ln_g_ref[...], ln_b_ref[...]).astype(compute_dtype)
        h = jnp.dot(ln, w1_ref[...],
                    preferred_element_type=jnp.float32) + b1_ref[...]
        h = h * jax.nn.sigmoid(1.702 * h)                          # QuickGELU
        out = jnp.dot(h.astype(compute_dtype), w2_ref[...],
                      preferred_element_type=jnp.float32) + b2_ref[...]
        o_ref[...] = (out + x).astype(o_ref.dtype)

    return kernel


def clip_layer(x, params, n_heads: int, *, compute_dtype=jnp.bfloat16,
               row_tile=None):
    B, S, D = x.shape
    assert D % n_heads == 0
    dh = D // n_heads
    scale = 1.0 / math.sqrt(dh)

    (ln1_g, ln1_b, w_in, b_in, w_out, b_out,
     ln2_g, ln2_b, w1, b1, w2, b2) = params

    # ---- wrapper-side layout plumbing (done once) -------------------------
    wq, wk, wv = (w_in[:, i * D:(i + 1) * D] for i in range(3))
    bq, bk, bv = (b_in[:, i * D:(i + 1) * D] for i in range(3))

    def w_heads(w):                       # (D, D) -> (H, D, dh)
        return jnp.transpose(w.reshape(D, n_heads, dh), (1, 0, 2))

    def b_heads(b):                       # (1, D) -> (H, 1, dh)
        return b.reshape(n_heads, 1, dh)

    wq_h = (w_heads(wq) * scale).astype(compute_dtype)   # fold softmax scale
    wk_h = w_heads(wk).astype(compute_dtype)
    wv_h = w_heads(wv).astype(compute_dtype)
    bq_h = (b_heads(bq) * scale).astype(jnp.float32)
    bk_h = b_heads(bk).astype(jnp.float32)
    bv_h = b_heads(bv).astype(jnp.float32)
    wo_h = w_out.reshape(n_heads, dh, D).astype(compute_dtype)

    x_spec = pl.BlockSpec((1, S, D), lambda b, h: (b, 0, 0))
    vec_spec = pl.BlockSpec((1, D), lambda b, h: (0, 0))
    head_w_spec = pl.BlockSpec((1, D, dh), lambda b, h: (h, 0, 0))
    head_b_spec = pl.BlockSpec((1, 1, dh), lambda b, h: (h, 0, 0))
    head_wo_spec = pl.BlockSpec((1, dh, D), lambda b, h: (h, 0, 0))

    attn_out = pl.pallas_call(
        _make_attn_kernel(compute_dtype),
        out_shape=jax.ShapeDtypeStruct((B, S, D), x.dtype),
        grid_spec=pltpu.PrefetchScalarGridSpec(
            num_scalar_prefetch=0,
            grid=(B, n_heads),
            in_specs=[x_spec, vec_spec, vec_spec,
                      head_w_spec, head_w_spec, head_w_spec,
                      head_b_spec, head_b_spec, head_b_spec,
                      head_wo_spec, vec_spec],
            out_specs=x_spec,
            scratch_shapes=[pltpu.VMEM((S, D), compute_dtype),   # LN1(x)
                            pltpu.VMEM((S, D), jnp.float32)],    # head accum
        ),
        compiler_params=pltpu.CompilerParams(
            dimension_semantics=("parallel", "arbitrary")),
    )(x, ln1_g, ln1_b, wq_h, wk_h, wv_h, bq_h, bk_h, bv_h, wo_h, b_out)

    # ---- MLP: tile over flattened rows ------------------------------------
    rows = B * S
    if row_tile is None:
        row_tile = rows if rows <= 256 else 256   # multiple of 8 or full dim

    w1_c = w1.astype(compute_dtype)
    w2_c = w2.astype(compute_dtype)

    # VMEM budget: only raise the scoped limit when the resident set needs it
    # (keeps headroom on v7x's 64 MiB physical VMEM for small problems).
    itm = jnp.dtype(compute_dtype).itemsize
    weight_bytes = (w1_c.size + w2_c.size) * itm + (b1.size + b2.size) * 4
    act_bytes = 4 * row_tile * D * 4 + 2 * row_tile * 4 * D * 4
    est = 2 * weight_bytes + act_bytes + (4 << 20)
    vmem_limit = int(est) if est > (24 << 20) else None

    mlp_out = pl.pallas_call(
        _make_mlp_kernel(compute_dtype),
        out_shape=jax.ShapeDtypeStruct((rows, D), x.dtype),
        grid_spec=pltpu.PrefetchScalarGridSpec(
            num_scalar_prefetch=0,
            grid=(pl.cdiv(rows, row_tile),),
            in_specs=[pl.BlockSpec((row_tile, D), lambda i: (i, 0)),
                      pl.BlockSpec((1, D), lambda i: (0, 0)),
                      pl.BlockSpec((1, D), lambda i: (0, 0)),
                      pl.BlockSpec((D, 4 * D), lambda i: (0, 0)),
                      pl.BlockSpec((1, 4 * D), lambda i: (0, 0)),
                      pl.BlockSpec((4 * D, D), lambda i: (0, 0)),
                      pl.BlockSpec((1, D), lambda i: (0, 0))],
            out_specs=pl.BlockSpec((row_tile, D), lambda i: (i, 0)),
        ),
        compiler_params=pltpu.CompilerParams(
            dimension_semantics=("parallel",),
            vmem_limit_bytes=vmem_limit),
    )(attn_out.reshape(rows, D), ln2_g, ln2_b, w1_c, b1, w2_c, b2)

    return mlp_out.reshape(B, S, D)


def init_params(key, n_embed: int):
    ks = jax.random.split(key, 6)
    std = 0.05
    # weights stored as (in, out) so the kernels compute x @ W + b
    ln1_g = jnp.ones((1, n_embed), jnp.float32)
    ln1_b = jnp.zeros((1, n_embed), jnp.float32)
    w_in = std * jax.random.normal(ks[0], (n_embed, 3 * n_embed), jnp.float32)
    b_in = std * jax.random.normal(ks[1], (1, 3 * n_embed), jnp.float32)
    w_out = std * jax.random.normal(ks[2], (n_embed, n_embed), jnp.float32)
    b_out = std * jax.random.normal(ks[3], (1, n_embed), jnp.float32)
    ln2_g = jnp.ones((1, n_embed), jnp.float32)
    ln2_b = jnp.zeros((1, n_embed), jnp.float32)
    w1 = std * jax.random.normal(ks[4], (n_embed, 4 * n_embed), jnp.float32)
    b1 = jnp.zeros((1, 4 * n_embed), jnp.float32)
    w2 = std * jax.random.normal(ks[5], (4 * n_embed, n_embed), jnp.float32)
    b2 = jnp.zeros((1, n_embed), jnp.float32)
    return (ln1_g, ln1_b, w_in, b_in, w_out, b_out,
            ln2_g, ln2_b, w1, b1, w2, b2)


def clip_layer_ref(x, params, n_heads: int):
    """Pure-JAX reference mirroring the PyTorch forward."""
    (ln1_g, ln1_b, w_in, b_in, w_out, b_out,
     ln2_g, ln2_b, w1, b1, w2, b2) = params
    B, S, D = x.shape
    dh = D // n_heads

    def ln(v, g, b):
        m = v.mean(-1, keepdims=True)
        var = ((v - m) ** 2).mean(-1, keepdims=True)
        return (v - m) / jnp.sqrt(var + 1e-5) * g + b

    res = x
    h = ln(x, ln1_g, ln1_b)
    qkv = h @ w_in + b_in
    q, k, v = jnp.split(qkv, 3, axis=-1)
    q = q.reshape(B, S, n_heads, dh).transpose(0, 2, 1, 3)
    k = k.reshape(B, S, n_heads, dh).transpose(0, 2, 1, 3)
    v = v.reshape(B, S, n_heads, dh).transpose(0, 2, 1, 3)
    w = jnp.einsum("bhqd,bhkd->bhqk", q, k)
    mask = jnp.triu(jnp.ones((S, S), bool), 1)
    w = jnp.where(mask, -jnp.inf, w) / math.sqrt(dh)
    w = jax.nn.softmax(w, axis=-1)
    o = jnp.einsum("bhqk,bhkd->bhqd", w, v).transpose(0, 2, 1, 3).reshape(B, S, D)
    o = o @ w_out + b_out
    x1 = o + res
    res2 = x1
    h2 = ln(x1, ln2_g, ln2_b)
    h2 = h2 @ w1 + b1
    h2 = h2 * jax.nn.sigmoid(1.702 * h2)
    h2 = h2 @ w2 + b2
    return h2 + res2


if __name__ == "__main__":
    B, S, D, H = 2, 8, 32, 4
    key = jax.random.PRNGKey(0)
    kx, kp = jax.random.split(key)
    x = jax.random.normal(kx, (B, S, D), jnp.float32)
    params = init_params(kp, D)

    ref = clip_layer_ref(x, params, H)

    # f32 compute path (tighter check; approx reciprocal still used)
    out_f32 = jax.block_until_ready(
        clip_layer(x, params, H, compute_dtype=jnp.float32))
    assert jnp.allclose(out_f32, ref, atol=5e-3, rtol=5e-3), \
        "f32 mismatch vs reference"

    # bf16 matmul path (default, MXU-native), f32 accumulation
    out_bf16 = jax.block_until_ready(clip_layer(x, params, H))
    assert jnp.allclose(out_bf16, ref, atol=5e-2, rtol=5e-2), \
        "bf16 mismatch vs reference"

    print("KERNEL_OK")
</pallas_src>

<mosaic_0001>
module attributes {stable_mosaic.version = 11 : i64} {
  func.func @kernel(%arg0: i32, %arg1: i32, %arg2: memref<1x8x32xf32, #tpu.memory_space<vmem>>, %arg3: memref<1x32xf32, #tpu.memory_space<vmem>>, %arg4: memref<1x32xf32, #tpu.memory_space<vmem>>, %arg5: memref<1x32x8xf32, #tpu.memory_space<vmem>>, %arg6: memref<1x32x8xf32, #tpu.memory_space<vmem>>, %arg7: memref<1x32x8xf32, #tpu.memory_space<vmem>>, %arg8: memref<1x1x8xf32, #tpu.memory_space<vmem>>, %arg9: memref<1x1x8xf32, #tpu.memory_space<vmem>>, %arg10: memref<1x1x8xf32, #tpu.memory_space<vmem>>, %arg11: memref<1x8x32xf32, #tpu.memory_space<vmem>>, %arg12: memref<1x32xf32, #tpu.memory_space<vmem>>, %arg13: memref<1x8x32xf32, #tpu.memory_space<vmem>>, %arg14: memref<8x32xf32, #tpu.memory_space<vmem>>, %arg15: memref<8x32xf32, #tpu.memory_space<vmem>>) attributes {dimension_semantics = [#tpu.dimension_semantics<parallel>, #tpu.dimension_semantics<arbitrary>], iteration_bounds = array<i64: 2, 4>, scalar_prefetch = 0 : i64, scratch_operands = 2 : i64, tpu.core_type = #tpu.core_type<tc>, window_params = [{transform_indices = @transform_0, window_bounds = array<i64: 1, 8, 32>}, {pipeline_mode = #tpu.pipeline_mode<synchronous>, transform_indices = @transform_1, window_bounds = array<i64: 1, 32>}, {pipeline_mode = #tpu.pipeline_mode<synchronous>, transform_indices = @transform_2, window_bounds = array<i64: 1, 32>}, {transform_indices = @transform_3, window_bounds = array<i64: 1, 32, 8>}, {transform_indices = @transform_4, window_bounds = array<i64: 1, 32, 8>}, {transform_indices = @transform_5, window_bounds = array<i64: 1, 32, 8>}, {transform_indices = @transform_6, window_bounds = array<i64: 1, 1, 8>}, {transform_indices = @transform_7, window_bounds = array<i64: 1, 1, 8>}, {transform_indices = @transform_8, window_bounds = array<i64: 1, 1, 8>}, {transform_indices = @transform_9, window_bounds = array<i64: 1, 8, 32>}, {pipeline_mode = #tpu.pipeline_mode<synchronous>, transform_indices = @transform_10, window_bounds = array<i64: 1, 32>}, {transform_indices = @transform_11, window_bounds = array<i64: 1, 8, 32>}]} {
    %c0_i32 = arith.constant 0 : i32
    %0 = arith.cmpi eq, %arg1, %c0_i32 : i32
    %1 = arith.extui %0 : i1 to i32
    %c0_i32_0 = arith.constant 0 : i32
    %2 = arith.cmpi ne, %1, %c0_i32_0 : i32
    scf.if %2 {
      %c0_36 = arith.constant 0 : index
      %c0_37 = arith.constant 0 : index
      %c0_38 = arith.constant 0 : index
      %51 = vector.load %arg2[%c0_36, %c0_37, %c0_38] : memref<1x8x32xf32, #tpu.memory_space<vmem>>, vector<1x8x32xf32>
      %52 = vector.shape_cast %51 : vector<1x8x32xf32> to vector<8x32xf32>
      %c0_39 = arith.constant 0 : index
      %c0_40 = arith.constant 0 : index
      %53 = vector.load %arg3[%c0_39, %c0_40] : memref<1x32xf32, #tpu.memory_space<vmem>>, vector<1x32xf32>
      %c0_41 = arith.constant 0 : index
      %c0_42 = arith.constant 0 : index
      %54 = vector.load %arg4[%c0_41, %c0_42] : memref<1x32xf32, #tpu.memory_space<vmem>>, vector<1x32xf32>
      %cst_43 = arith.constant dense<0.000000e+00> : vector<8xf32>
      %55 = vector.multi_reduction <add>, %52, %cst_43 [1] : vector<8x32xf32> to vector<8xf32>
      %56 = vector.shape_cast %55 : vector<8xf32> to vector<8x1xf32>
      %cst_44 = arith.constant 3.200000e+01 : f32
      %57 = vector.broadcast %cst_44 : f32 to vector<8x1xf32>
      %58 = arith.divf %56, %57 : vector<8x1xf32>
      %59 = vector.broadcast %58 : vector<8x1xf32> to vector<8x32xf32>
      %60 = arith.subf %52, %59 : vector<8x32xf32>
      %61 = arith.mulf %60, %60 : vector<8x32xf32>
      %cst_45 = arith.constant dense<0.000000e+00> : vector<8xf32>
      %62 = vector.multi_reduction <add>, %61, %cst_45 [1] : vector<8x32xf32> to vector<8xf32>
      %63 = vector.shape_cast %62 : vector<8xf32> to vector<8x1xf32>
      %cst_46 = arith.constant 3.200000e+01 : f32
      %64 = vector.broadcast %cst_46 : f32 to vector<8x1xf32>
      %65 = arith.divf %63, %64 : vector<8x1xf32>
      %66 = vector.broadcast %58 : vector<8x1xf32> to vector<8x32xf32>
      %67 = arith.subf %52, %66 : vector<8x32xf32>
      %cst_47 = arith.constant 9.99999974E-6 : f32
      %68 = vector.broadcast %cst_47 : f32 to vector<8x1xf32>
      %69 = arith.addf %65, %68 : vector<8x1xf32>
      %70 = math.rsqrt %69 : vector<8x1xf32>
      %71 = vector.broadcast %70 : vector<8x1xf32> to vector<8x32xf32>
      %72 = arith.mulf %67, %71 : vector<8x32xf32>
      %73 = vector.broadcast %53 : vector<1x32xf32> to vector<8x32xf32>
      %74 = arith.mulf %72, %73 : vector<8x32xf32>
      %75 = vector.broadcast %54 : vector<1x32xf32> to vector<8x32xf32>
      %76 = arith.addf %74, %75 : vector<8x32xf32>
      %c0_48 = arith.constant 0 : index
      %c0_49 = arith.constant 0 : index
      %77 = vector.load %arg14[%c0_48, %c0_49] : memref<8x32xf32, #tpu.memory_space<vmem>>, vector<8x32xf32>
      tpu.vector_store %arg14[%c0_48, %c0_49], %76 {strides = array<i32>} : memref<8x32xf32, #tpu.memory_space<vmem>>, vector<8x32xf32>,
      %c0_50 = arith.constant 0 : index
      %c0_51 = arith.constant 0 : index
      %78 = vector.load %arg12[%c0_50, %c0_51] : memref<1x32xf32, #tpu.memory_space<vmem>>, vector<1x32xf32>
      %79 = vector.broadcast %78 : vector<1x32xf32> to vector<8x32xf32>
      %80 = arith.addf %52, %79 : vector<8x32xf32>
      %c0_52 = arith.constant 0 : index
      %c0_53 = arith.constant 0 : index
      %81 = vector.load %arg15[%c0_52, %c0_53] : memref<8x32xf32, #tpu.memory_space<vmem>>, vector<8x32xf32>
      tpu.vector_store %arg15[%c0_52, %c0_53], %80 {strides = array<i32>} : memref<8x32xf32, #tpu.memory_space<vmem>>, vector<8x32xf32>,
    } else {
    }
    %c0 = arith.constant 0 : index
    %c0_1 = arith.constant 0 : index
    %3 = vector.load %arg14[%c0, %c0_1] : memref<8x32xf32, #tpu.memory_space<vmem>>, vector<8x32xf32>
    %c0_2 = arith.constant 0 : index
    %c0_3 = arith.constant 0 : index
    %c0_4 = arith.constant 0 : index
    %4 = vector.load %arg5[%c0_2, %c0_3, %c0_4] : memref<1x32x8xf32, #tpu.memory_space<vmem>>, vector<1x32x8xf32>
    %5 = vector.shape_cast %4 : vector<1x32x8xf32> to vector<32x8xf32>
    %cst = arith.constant dense<0.000000e+00> : vector<8x8xf32>
    %6 = tpu.matmul %3, %5, %cst {dimension_numbers = #tpu.dot_dimension_numbers<[1], [0], [0], [1], [0, 0, 1, 1], [], []>} : vector<8x32xf32>, vector<32x8xf32>, vector<8x8xf32> -> vector<8x8xf32>
    %c0_5 = arith.constant 0 : index
    %c0_6 = arith.constant 0 : index
    %c0_7 = arith.constant 0 : index
    %7 = vector.load %arg8[%c0_5, %c0_6, %c0_7] : memref<1x1x8xf32, #tpu.memory_space<vmem>>, vector<1x1x8xf32>
    %8 = vector.shape_cast %7 : vector<1x1x8xf32> to vector<1x8xf32>
    %9 = vector.broadcast %8 : vector<1x8xf32> to vector<8x8xf32>
    %10 = arith.addf %6, %9 : vector<8x8xf32>
    %c0_8 = arith.constant 0 : index
    %c0_9 = arith.constant 0 : index
    %c0_10 = arith.constant 0 : index
    %11 = vector.load %arg6[%c0_8, %c0_9, %c0_10] : memref<1x32x8xf32, #tpu.memory_space<vmem>>, vector<1x32x8xf32>
    %12 = vector.shape_cast %11 : vector<1x32x8xf32> to vector<32x8xf32>
    %cst_11 = arith.constant dense<0.000000e+00> : vector<8x8xf32>
    %13 = tpu.matmul %3, %12, %cst_11 {dimension_numbers = #tpu.dot_dimension_numbers<[1], [0], [0], [1], [0, 0, 1, 1], [], []>} : vector<8x32xf32>, vector<32x8xf32>, vector<8x8xf32> -> vector<8x8xf32>
    %c0_12 = arith.constant 0 : index
    %c0_13 = arith.constant 0 : index
    %c0_14 = arith.constant 0 : index
    %14 = vector.load %arg9[%c0_12, %c0_13, %c0_14] : memref<1x1x8xf32, #tpu.memory_space<vmem>>, vector<1x1x8xf32>
    %15 = vector.shape_cast %14 : vector<1x1x8xf32> to vector<1x8xf32>
    %16 = vector.broadcast %15 : vector<1x8xf32> to vector<8x8xf32>
    %17 = arith.addf %13, %16 : vector<8x8xf32>
    %c0_15 = arith.constant 0 : index
    %c0_16 = arith.constant 0 : index
    %c0_17 = arith.constant 0 : index
    %18 = vector.load %arg7[%c0_15, %c0_16, %c0_17] : memref<1x32x8xf32, #tpu.memory_space<vmem>>, vector<1x32x8xf32>
    %19 = vector.shape_cast %18 : vector<1x32x8xf32> to vector<32x8xf32>
    %cst_18 = arith.constant dense<0.000000e+00> : vector<8x8xf32>
    %20 = tpu.matmul %3, %19, %cst_18 {dimension_numbers = #tpu.dot_dimension_numbers<[1], [0], [0], [1], [0, 0, 1, 1], [], []>} : vector<8x32xf32>, vector<32x8xf32>, vector<8x8xf32> -> vector<8x8xf32>
    %c0_19 = arith.constant 0 : index
    %c0_20 = arith.constant 0 : index
    %c0_21 = arith.constant 0 : index
    %21 = vector.load %arg10[%c0_19, %c0_20, %c0_21] : memref<1x1x8xf32, #tpu.memory_space<vmem>>, vector<1x1x8xf32>
    %22 = vector.shape_cast %21 : vector<1x1x8xf32> to vector<1x8xf32>
    %23 = vector.broadcast %22 : vector<1x8xf32> to vector<8x8xf32>
    %24 = arith.addf %20, %23 : vector<8x8xf32>
    %cst_22 = arith.constant dense<0.000000e+00> : vector<8x8xf32>
    %25 = tpu.matmul %10, %17, %cst_22 {dimension_numbers = #tpu.dot_dimension_numbers<[1], [1], [0], [0], [0, 0, 1, 0], [], []>} : vector<8x8xf32>, vector<8x8xf32>, vector<8x8xf32> -> vector<8x8xf32>
    %26 = tpu.iota {dimensions = array<i32: 0>} : vector<8x8xi32>
    %27 = tpu.iota {dimensions = array<i32: 1>} : vector<8x8xi32>
    %28 = arith.cmpi sgt, %27, %26 : vector<8x8xi32>
    %cst_23 = arith.constant 0xFF800000 : f32
    %29 = vector.broadcast %cst_23 : f32 to vector<8x8xf32>
    %30 = arith.select %28, %29, %25 : vector<8x8xi1>, vector<8x8xf32>
    %cst_24 = arith.constant dense<0xFF800000> : vector<8xf32>
    %31 = vector.multi_reduction <maximumf>, %30, %cst_24 [1] : vector<8x8xf32> to vector<8xf32>
    %32 = vector.shape_cast %31 : vector<8xf32> to vector<8x1xf32>
    %33 = vector.broadcast %32 : vector<8x1xf32> to vector<8x8xf32>
    %34 = arith.subf %30, %33 : vector<8x8xf32>
    %35 = math.exp %34 : vector<8x8xf32>
    %cst_25 = arith.constant dense<0.000000e+00> : vector<8xf32>
    %36 = vector.multi_reduction <add>, %35, %cst_25 [1] : vector<8x8xf32> to vector<8xf32>
    %37 = vector.shape_cast %36 : vector<8xf32> to vector<8x1xf32>
    %38 = tpu.reciprocal %37 {approx = true} : vector<8x1xf32> -> vector<8x1xf32>
    %39 = vector.broadcast %38 : vector<8x1xf32> to vector<8x8xf32>
    %40 = arith.mulf %35, %39 : vector<8x8xf32>
    %cst_26 = arith.constant dense<0.000000e+00> : vector<8x8xf32>
    %41 = tpu.matmul %40, %24, %cst_26 {dimension_numbers = #tpu.dot_dimension_numbers<[1], [0], [0], [1], [0, 0, 1, 1], [], []>} : vector<8x8xf32>, vector<8x8xf32>, vector<8x8xf32> -> vector<8x8xf32>
    %c0_27 = arith.constant 0 : index
    %c0_28 = arith.constant 0 : index
    %c0_29 = arith.constant 0 : index
    %42 = vector.load %arg11[%c0_27, %c0_28, %c0_29] : memref<1x8x32xf32, #tpu.memory_space<vmem>>, vector<1x8x32xf32>
    %43 = vector.shape_cast %42 : vector<1x8x32xf32> to vector<8x32xf32>
    %cst_30 = arith.constant dense<0.000000e+00> : vector<8x32xf32>
    %44 = tpu.matmul %41, %43, %cst_30 {dimension_numbers = #tpu.dot_dimension_numbers<[1], [0], [0], [1], [0, 0, 1, 1], [], []>} : vector<8x8xf32>, vector<8x32xf32>, vector<8x32xf32> -> vector<8x32xf32>
    %c0_31 = arith.constant 0 : index
    %c0_32 = arith.constant 0 : index
    %45 = vector.load %arg15[%c0_31, %c0_32] : memref<8x32xf32, #tpu.memory_space<vmem>>, vector<8x32xf32>
    %46 = arith.addf %45, %44 : vector<8x32xf32>
    %c0_33 = arith.constant 0 : index
    %c0_34 = arith.constant 0 : index
    %47 = vector.load %arg15[%c0_33, %c0_34] : memref<8x32xf32, #tpu.memory_space<vmem>>, vector<8x32xf32>
    tpu.vector_store %arg15[%c0_33, %c0_34], %46 {strides = array<i32>} : memref<8x32xf32, #tpu.memory_space<vmem>>, vector<8x32xf32>,
    %c3_i32 = arith.constant 3 : i32
    %48 = arith.cmpi eq, %arg1, %c3_i32 : i32
    %49 = arith.extui %48 : i1 to i32
    %c0_i32_35 = arith.constant 0 : i32
    %50 = arith.cmpi ne, %49, %c0_i32_35 : i32
    scf.if %50 {
      %c0_36 = arith.constant 0 : index
      %c0_37 = arith.constant 0 : index
      %51 = vector.load %arg15[%c0_36, %c0_37] : memref<8x32xf32, #tpu.memory_space<vmem>>, vector<8x32xf32>
      %c0_38 = arith.constant 0 : index
      %c0_39 = arith.constant 0 : index
      %c0_40 = arith.constant 0 : index
      %52 = vector.load %arg13[%c0_38, %c0_39, %c0_40] : memref<1x8x32xf32, #tpu.memory_space<vmem>>, vector<1x8x32xf32>
      %53 = vector.shape_cast %52 : vector<1x8x32xf32> to vector<8x32xf32>
      %54 = vector.shape_cast %51 : vector<8x32xf32> to vector<1x8x32xf32>
      tpu.vector_store %arg13[%c0_38, %c0_39, %c0_40], %54 {strides = array<i32>} : memref<1x8x32xf32, #tpu.memory_space<vmem>>, vector<1x8x32xf32>,
    } else {
    }
    return
  }
  func.func @transform_0(%arg0: i32, %arg1: i32) -> (i32, i32, i32) {
    %c0_i32 = arith.constant 0 : i32
    %c0_i32_0 = arith.constant 0 : i32
    %c0_i32_1 = arith.constant 0 : i32
    return %arg0, %c0_i32, %c0_i32_0 : i32, i32, i32
  }
  func.func @transform_1(%arg0: i32, %arg1: i32) -> (i32, i32) {
    %c0_i32 = arith.constant 0 : i32
    %c0_i32_0 = arith.constant 0 : i32
    %c0_i32_1 = arith.constant 0 : i32
    return %c0_i32, %c0_i32_0 : i32, i32
  }
  func.func @transform_2(%arg0: i32, %arg1: i32) -> (i32, i32) {
    %c0_i32 = arith.constant 0 : i32
    %c0_i32_0 = arith.constant 0 : i32
    %c0_i32_1 = arith.constant 0 : i32
    return %c0_i32, %c0_i32_0 : i32, i32
  }
  func.func @transform_3(%arg0: i32, %arg1: i32) -> (i32, i32, i32) {
    %c0_i32 = arith.constant 0 : i32
    %c0_i32_0 = arith.constant 0 : i32
    %c0_i32_1 = arith.constant 0 : i32
    return %arg1, %c0_i32, %c0_i32_0 : i32, i32, i32
  }
  func.func @transform_4(%arg0: i32, %arg1: i32) -> (i32, i32, i32) {
    %c0_i32 = arith.constant 0 : i32
    %c0_i32_0 = arith.constant 0 : i32
    %c0_i32_1 = arith.constant 0 : i32
    return %arg1, %c0_i32, %c0_i32_0 : i32, i32, i32
  }
  func.func @transform_5(%arg0: i32, %arg1: i32) -> (i32, i32, i32) {
    %c0_i32 = arith.constant 0 : i32
    %c0_i32_0 = arith.constant 0 : i32
    %c0_i32_1 = arith.constant 0 : i32
    return %arg1, %c0_i32, %c0_i32_0 : i32, i32, i32
  }
  func.func @transform_6(%arg0: i32, %arg1: i32) -> (i32, i32, i32) {
    %c0_i32 = arith.constant 0 : i32
    %c0_i32_0 = arith.constant 0 : i32
    %c0_i32_1 = arith.constant 0 : i32
    return %arg1, %c0_i32, %c0_i32_0 : i32, i32, i32
  }
  func.func @transform_7(%arg0: i32, %arg1: i32) -> (i32, i32, i32) {
    %c0_i32 = arith.constant 0 : i32
    %c0_i32_0 = arith.constant 0 : i32
    %c0_i32_1 = arith.constant 0 : i32
    return %arg1, %c0_i32, %c0_i32_0 : i32, i32, i32
  }
  func.func @transform_8(%arg0: i32, %arg1: i32) -> (i32, i32, i32) {
    %c0_i32 = arith.constant 0 : i32
    %c0_i32_0 = arith.constant 0 : i32
    %c0_i32_1 = arith.constant 0 : i32
    return %arg1, %c0_i32, %c0_i32_0 : i32, i32, i32
  }
  func.func @transform_9(%arg0: i32, %arg1: i32) -> (i32, i32, i32) {
    %c0_i32 = arith.constant 0 : i32
    %c0_i32_0 = arith.constant 0 : i32
    %c0_i32_1 = arith.constant 0 : i32
    return %arg1, %c0_i32, %c0_i32_0 : i32, i32, i32
  }
  func.func @transform_10(%arg0: i32, %arg1: i32) -> (i32, i32) {
    %c0_i32 = arith.constant 0 : i32
    %c0_i32_0 = arith.constant 0 : i32
    %c0_i32_1 = arith.constant 0 : i32
    return %c0_i32, %c0_i32_0 : i32, i32
  }
  func.func @transform_11(%arg0: i32, %arg1: i32) -> (i32, i32, i32) {
    %c0_i32 = arith.constant 0 : i32
    %c0_i32_0 = arith.constant 0 : i32
    %c0_i32_1 = arith.constant 0 : i32
    return %arg0, %c0_i32, %c0_i32_0 : i32, i32, i32
  }
}

</mosaic_0001>

<bundles_post_ra>
// kernel: tpu_custom_call.1
= control target key start
LH: loop header
LB: loop body
LE: loop exit
PB: predicated region body
PF: predicated region fallthrough
CT: control target
= control target key end

     0   :  { %s1814_s0 = inlined_call_operand.vmem [shape: f32[2,8,32], index: 0, kind: input, shape index: {}]   ;;  %s1815_s1 = inlined_call_operand.vmem [shape: f32[1,32], index: 1, kind: input, shape index: {}]   ;;  %s1816_s2 = inlined_call_operand.vmem [shape: f32[1,32], index: 2, kind: input, shape index: {}]   ;;  %s1817_s3 = inlined_call_operand.vmem [shape: f32[4,32,8], index: 3, kind: input, shape index: {}]   ;;  %s1818_s4 = inlined_call_operand.vmem [shape: f32[4,32,8], index: 4, kind: input, shape index: {}]   ;;  %s1819_s5 = inlined_call_operand.vmem [shape: f32[4,32,8], index: 5, kind: input, shape index: {}]   ;;  %s1820_s6 = inlined_call_operand.vmem [shape: f32[4,1,8], index: 6, kind: input, shape index: {}]   ;;  %s1821_s7 = inlined_call_operand.vmem [shape: f32[4,1,8], index: 7, kind: input, shape index: {}]   ;;  %s1822_s8 = inlined_call_operand.vmem [shape: f32[4,1,8], index: 8, kind: input, shape index: {}]   ;;  %s1823_s9 = inlined_call_operand.vmem [shape: f32[4,8,32], index: 9, kind: input, shape index: {}]   ;;  %s1824_s10 = inlined_call_operand.vmem [shape: f32[1,32], index: 10, kind: input, shape index: {}]   ;;  %s1825_s11 = inlined_call_operand.hbm [shape: f32[2,8,32], index: 11, kind: output, shape index: {}]  }
   0x1   :  { %1840 = sst [smem:[#allocation19_spill]] %s1814_s0 }
   0x2   :  { %1841 = sst [smem:[#allocation20_spill]] %s1817_s3 }
   0x3   :  { %1842 = sst [smem:[#allocation21_spill]] %s1818_s4 }
   0x4   :  { %1843 = sst [smem:[#allocation22_spill]] %s1825_s11 }
   0x5   :  { %16 = vsyncpa [#allocation5], 0 }
   0x6   :  { %18 = vsyncpa [#allocation5 + $0x1], 0  ;;  %s1579_s17 = smov 0   ;;  %s1581_s18 = smov 0  }
   0x7   :  { %s1583_s19 = smov 0   ;;  %s1585_s20 = smov 0  }
   0x8   :  { %s1587_s21 = smov 0   ;;  %s1589_s22 = smov 0  }
   0x9   :  { %s1591_s23 = smov 0   ;;  %s1593_s24 = smov 0  }
   0xa LB: > { %1844 = sst [smem:[#allocation7_spill]] %s1485_s17  ;;  %s1216_s25 = sadd.s32 4294967295, %s1513_s24   ;;  %s1513_s24 = sphi %s1593_s24, %s24_s24   ;;  %s1509_s23 = sphi %s1591_s23, %s1876_s23   ;;  %s1505_s22 = sphi %s1589_s22, %s1875_s22   ;;  %s1501_s21 = sphi %s1587_s21, %s1874_s21   ;;  %s1497_s20 = sphi %s1585_s20, %s1873_s20   ;;  %s1493_s19 = sphi %s1583_s19, %s1872_s19   ;;  %s1489_s18 = sphi %s1581_s18, %s1871_s18   ;;  %s1485_s17 = sphi %s1579_s17, %s1870_s17  }
   0xb   : > { %1845 = sst [smem:[#allocation8_spill]] %s1489_s18  ;;  %s1217_s26 = sadd.s32 4294967294, %s1513_s24  }
   0xc   : > { %1846 = sst [smem:[#allocation9_spill]] %s1493_s19  ;;  %s33_s27 = sadd.s32 1, %s1505_s22 }
   0xd   : > { %1847 = sst [smem:[#allocation10_spill]] %s1501_s21  ;;  %p34_p0 = scmp.ge.s32.totalorder %s33_s27, 4 }
   0xe   : > { %1848 = sst [smem:[#allocation11_spill]] %s1505_s22  ;;  %s36_s28 = sadd.s32 1, %s1509_s23 }
   0xf   : > { %1849 = sst [smem:[#allocation12_spill]] %s1509_s23  ;;  %p324_p1 = scmp.ne.s32.totalorder %s1493_s19, %s1489_s18 }
  0x10   : > { %1850 = sst [smem:[#allocation13_spill]] %s1513_s24  ;;  %p325_p2 = scmp.eq.s32.totalorder %s1216_s25, 7 }
  0x11   : > { %s1878_s27 = smov (%p34_p0, %s33_s27), 0  ;;  %s1880_s28 = smov (!%p34_p0, %s36_s28), %s1509_s23 }
  0x12   : > { %1851 = sst [smem:[#allocation14_spill]] %s1878_s27  ;;  %p1628_p3 = por %p325_p2, %p324_p1 }
  0x13   : > { %p330_p4 = scmp.ne.s32.totalorder %s1489_s18, %s1485_s17  ;;  %p38_p5 = scmp.ge.s32.totalorder %s1880_s28, 2 }
  0x14   : > { %s1852_s29 = scalar_select %p1628_p3, 1, 0 }
  0x15   : > { %p331_p6 = scmp.eq.s32.totalorder %s1217_s26, 7  ;;  %p1220_p7 = scmp.ge.s32.totalorder %s1513_s24, 1 }
  0x16   : > { %1853 = sst [smem:[#allocation15_spill]] %s1852_s29  ;;  %p414_p8 = scmp.lt.s32.totalorder %s1513_s24, 9 }
  0x17   : > { %s1882_s28 = smov (%p38_p5, %s1880_s28), 0  ;;  %p1638_p9 = por %p331_p6, %p330_p4 }
  0x18   : > { %1854 = sst [smem:[#allocation16_spill]] %s1882_s28  ;;  %p415_p10 = pnand %p1220_p7, %p414_p8 }
  0x19   : > { %s1855_s30 = scalar_select %p1638_p9, 1, 0 }
  0x1a   : > { %s311_s12 = ssub.s32 %s1509_s23, %s1882_s28  ;;  %s314_s13 = sadd.s32 1, %s1493_s19 }
  0x1b   : > { %1856 = sst [smem:[#allocation17_spill]] %s1855_s30  ;;  %p312_p11 = scmp.eq.s32.totalorder %s311_s12, 0 }
  0x1c   : > { %418 = sbr.rel (%p415_p10) target bundleno = 1569 (0x621), region = 64  ;;  %s1829_s15 = sand.u32 (!%p415_p10), 1, %s1489_s18  }
  0x1d   : > { %s1646_s14 = scalar_select %p312_p11, %s1493_s19, %s314_s13  }
  0x1e   : > { %p481_p12 = scmp.lt.s32.totalorder (!%p415_p10), %s1501_s21, 1  ;;  %s1652_s16 = sshll.u32 (!%p415_p10), %s1829_s15, 3 }
  0x1f   : > { %1857 = sst [smem:[#allocation18_spill]] %s1646_s14  ;;  %p485_p13 = scmp.lt.s32.totalorder (!%p415_p10), %s1497_s20, 3 }
  0x20   : > { %s1858_s0 = sld [smem:[#allocation19_spill]] (!%p415_p10)  ;;  %s1859_s3 = sld [smem:[#allocation20_spill]] (!%p415_p10) }
  0x21   : > { %s1860_s4 = sld [smem:[#allocation21_spill]] (!%p415_p10)  ;;  %s480_s11 = scalar_lea.vmem (!%p415_p10), [#allocation4], %s1652_s16 }
  0x22   : > { %p1230_p0 = scmp.ne.s32.totalorder (!%p415_p10), %s1497_s20, 0 }
  0x23   : > { %s482_s25 = scalar_select %p481_p12, %s1501_s21, 1 }
  0x24   : > { %s1657_s26 = scalar_select %p485_p13, %s1497_s20, 3 }
  0x25   : > { %s1222_s12 = sshll.u32 %s482_s25, 3  ;;  %516 = sbr.rel (%p1230_p0) target bundleno = 354 (0x162), region = 68  ;;  %vm520_vm0 = vcmask (!%p1230_p0), 261120   ;;  %v1233_v1 = vld [vmem:[%s1824_s10] ss:$0 sm:$0xff] (!%p1230_p0) }
  0x26   : > { %s484_s27 = scalar_lea.vmem %s1858_s0, %s1222_s12  ;;  %s1249_s23 = sshll.u32 %s1657_s26, 5  ;;  %v1231_v13 = vld [vmem:[%s1815_s1] ss:$0 sm:$0xff] (!%p1230_p0) }
  0x27   : > { %s1666_s15 = scalar_lea.vmem %s1859_s3, %s1249_s23  ;;  %s1671_s17 = scalar_lea.vmem %s1860_s4, %s1249_s23  ;;  %v517_v0 = vld [vmem:[%s484_s27] sm:$0xff] (!%p1230_p0) }
  0x28   : > { %s1676_s29 = scalar_lea.vmem %s1819_s5, %s1249_s23  ;;  %s502_s28 = scalar_lea.vmem %s1820_s6, %s1657_s26  ;;  %v521_v2 = vsel (!%p1230_p0), %vm520_vm0, %v517_v0, 0.0  ;;  %v557_v3 = vadd.f32 (!%p1230_p0), %v1233_v1, %v517_v0  ;;  %v1232_v15 = vld [vmem:[%s1816_s2] ss:$0 sm:$0xff] (!%p1230_p0) }
  0x29   : > { %s505_s22 = scalar_lea.vmem %s1821_s7, %s1657_s26  ;;  %s508_s3 = scalar_lea.vmem %s1822_s8, %s1657_s26  ;;  %522 = vadd.xlane.f32.xlu0 (!%p1230_p0), %v521_v2 }
  0x2a   : > { %s1229_s19 = sshll.u32 %s1657_s26, 3  ;;  %558 = vst.msk [vmem:[#allocation3] sm:$0xff] (!%p1230_p0), %vm520_vm0, %v557_v3 }
  0x2b   : > { %s1694_s21 = scalar_lea.vmem %s1823_s9, %s1229_s19 }
  0xb6   : > { %v523_v4 = vpop.xlane.xlu0 %522 }
  0xb7   : > { %v525_v5 = vmul.f32 0.03125, %v523_v4 }
  0xb9   : > { %v526_v6 = vsub.f32 %v517_v0, %v525_v5 }
  0xbb   : > { %v527_v7 = vmul.f32 %v526_v6, %v526_v6 }
  0xbd   : > { %v528_v8 = vsel %vm520_vm0, %v527_v7, 0.0 }
  0xbe   : > { %529 = vadd.xlane.f32.xlu0 %v528_v8 }
 0x14b   : > { %v530_v9 = vpop.xlane.xlu0 %529 }
 0x14c   : > { %v531_v10 = vmul.f32 0.03125, %v530_v9 }
 0x14e   : > { %v532_v11 = vadd.f32 1e-05, %v531_v10 }
 0x150   : > { %1413 = vrsqrt.f32 %v532_v11 }
 0x15a   : > { %v1414_v12 = vpop.eup %1413 }
 0x15b   : > { %v534_v14 = vmul.f32 %v1414_v12, %v526_v6 }
 0x15d   : > { %v541_v16 = vmul.f32 %v1231_v13, %v534_v14 }
 0x15f   : > { %v548_v17 = vadd.f32 %v1232_v15, %v541_v16 }
 0x161   : > { %549 = vst.msk [vmem:[#allocation2] sm:$0xff] %vm520_vm0, %v548_v17 }
 0x162 PF: > { %v645_v18 = vld [vmem:[%s1671_s17] sm:$0xff]  ;;  %v646_v19 = vld [vmem:[%s1671_s17 + $0x8] sm:$0xff]  ;;  %v1515_v21 = vmov 0.0|0.0   ;;  %v647_v24 = vld [vmem:[%s1671_s17 + $0x10] sm:$0xff]  ;;  %vm1516_vm1 = vmmov 0   ;;  %v1517_v27 = vmov 0.0   ;;  %v884_v47 = vlaneseq }
 0x163   : > { %v560_v20 = vld [vmem:[%s1666_s15] sm:$0xff]  ;;  %1327 = vmatprep.subr.bf16.mxu1 %v1515_v21  ;;  %v1328_v22 = vpack.c.bf16 %v646_v19, %v645_v18  ;;  %1321 = vmatprep.subr.bf16.mxu0 %v1515_v21  ;;  %v561_v23 = vld [vmem:[%s1666_s15 + $0x8] sm:$0xff]  ;;  %v648_v25 = vld [vmem:[%s1671_s17 + $0x18] sm:$0xff]  ;;  %vm571_vm2 = vcmask 261120   ;;  %vm807_vm3 = vcmask 64512   ;;  %p1244_p1 = scmp.ne.s32.totalorder %s1497_s20, 3 }
 0x164   : > { %v1322_v26 = vpack.c.bf16 %v561_v23, %v560_v20  ;;  %1292 = vmatprep.mubr.msk.f32.mxu1 %vm1516_vm1, %v1517_v27  ;;  %v562_v28 = vld [vmem:[%s1666_s15 + $0x10] sm:$0xff]  ;;  %v563_v29 = vld [vmem:[%s1666_s15 + $0x18] sm:$0xff]  ;;  %1281 = vmatprep.mubr.msk.f32.mxu0 %vm1516_vm1, %v1517_v27  ;;  %v1331_v30 = vpack.c.bf16 %v648_v25, %v647_v24  ;;  %v1236_v33 = vld [vmem:[%s505_s22] ss:$0 sm:$0xff]  ;;  %v885_v48 = vshrl.u32 %v884_v47, 7  ;;  %v887_v49 = vand.u32 127, %v884_v47 }
 0x165   : > { %1329 = vmatpush3.bf16.msra.mxu1 %v1328_v22  ;;  %v1325_v31 = vpack.c.bf16 %v563_v29, %v562_v28  ;;  %v1234_v34 = vld [vmem:[%s502_s28] ss:$0 sm:$0xff]  ;;  %v727_v42 = vld [vmem:[%s1676_s29 + $0x8] sm:$0xff]  ;;  %v728_v43 = vld [vmem:[%s1676_s29 + $0x10] sm:$0xff] }
 0x166   : > { %1323 = vmatpush3.bf16.msra.mxu0 %v1322_v26  ;;  %1330 = vmatprep.subr.bf16.mxu1 %v1515_v21  ;;  %v726_v41 = vld [vmem:[%s1676_s29] sm:$0xff]  ;;  %v729_v45 = vld [vmem:[%s1676_s29 + $0x18] sm:$0xff]  ;;  %vm888_vm4 = vcmp.gt.s32.totalorder %v887_v49, %v885_v48 }
 0x167   : > { %1324 = vmatprep.subr.bf16.mxu0 %v1515_v21  ;;  %v1334_v44 = vpack.c.bf16 %v727_v42, %v726_v41  ;;  %v1337_v46 = vpack.c.bf16 %v729_v45, %v728_v43  ;;  %v1238_v60 = vld [vmem:[%s508_s3] ss:$0 sm:$0xff]  ;;  %v1048_v5 = vld [vmem:[#allocation3] sm:$0xff] }
 0x168   : > { %v559_v32 = vld [vmem:[#allocation2] sm:$0xff] }
 0x169   : > { %1332 = vmatpush3.bf16.msra.mxu1 %v1331_v30  ;;  %v974_v63 = vld [vmem:[%s1694_s21] sm:$0xff] }
 0x16a   : > { %1326 = vmatpush3.bf16.msra.mxu0 %v1325_v31  ;;  %1306 = vmatprep.subr.mxu1 %v1517_v27 }
 0x16b   : > { %1333 = vmatprep.subr.bf16.mxu0 %v1515_v21 }
 0x16c   : > { %1293 = vmatmul.mubr.msk.f32.vlgmr.msra.gmra.mrb[0].mxu1 %vm571_vm2, %v559_v32 }
 0x16d   : > { %1282 = vmatmul.mubr.msk.f32.vlgmr.msra.gmra.mrb[0].mxu0 %vm571_vm2, %v559_v32  ;;  %1308 = vmatprep.mubr.msk.f32.mxu1 %vm1516_vm1, %v1517_v27 }
 0x16e   : > { %1303 = vmatprep.mubr.msk.f32.mxu0 %vm1516_vm1, %v1517_v27  ;;  %1335 = vmatpush3.bf16.msra.mxu0 %v1334_v44 }
 0x16f   : > { %1336 = vmatprep.subr.bf16.mxu0 %v1515_v21 }
 0x172   : > { %1338 = vmatpush3.bf16.msra.mxu0 %v1337_v46 }
 0x173   : > { %1316 = vmatprep.subr.mxu0 %v1517_v27 }
 0x175   : > { %1304 = vmatmul.mubr.msk.f32.vlgmr.msra.gmra.mrb[2].mxu0 %vm571_vm2, %v559_v32 }
 0x176   : > { %1318 = vmatprep.mubr.msk.f32.mxu0 %vm1516_vm1, %v1517_v27  ;;  %1317 = vmatpush3.msra.mxu0 %v974_v63 }
 0x23f   : > { %v722_v35 = vpop.f32.mrb[0].mxu1 }
 0x240   : > { %v723_v36 = vadd.f32 %v1236_v33, %v722_v35  ;;  %v1294_v37 = vpop.f32.mrb[1].mxu1  ;;  %v641_v38 = vpop.f32.mrb[0].mxu0 }
 0x241   : > { %v642_v39 = vadd.f32 %v1234_v34, %v641_v38  ;;  %v1283_v40 = vpop.f32.mrb[1].mxu0 }
 0x242   : > { %1307 = vmatpush3.xpose.msk.msra.mxu1 %vm807_vm3, %v723_v36 }
 0x243   : > { %1311 = vmatprep.subr.mxu1 %v1517_v27 }
 0x245   : > { %1309 = vmatmul.mubr.msk.f32.vlgmr.msra.gmra.mrb[2].mxu1 %vm807_vm3, %v642_v39 }
 0x246   : > { %1313 = vmatprep.mubr.msk.f32.mxu1 %vm1516_vm1, %v1517_v27 }
 0x248   : > { %v803_v59 = vpop.f32.mrb[2].mxu0 }
 0x249   : > { %v1305_v61 = vpop.f32.mrb[3].mxu0  ;;  %v804_v62 = vadd.f32 %v1238_v60, %v803_v59 }
 0x24b   : > { %1312 = vmatpush3.msra.mxu1 %v804_v62 }
 0x318   : > { %v880_v50 = vpop.f32.mrb[2].mxu1 }
 0x319   : > { %v889_v51 = vsel %vm888_vm4, -inf, %v880_v50  ;;  %v1310_v52 = vpop.f32.mrb[3].mxu1 }
 0x31a   : > { %v890_v53 = vsel %vm807_vm3, %v889_v51, -inf }
 0x31b   : > { %891 = vmax.xlane.f32.xlu0 %v890_v53 }
 0x3a8   : > { %v892_v54 = vpop.xlane.xlu0 %891 }
 0x3a9   : > { %v893_v55 = vsub.f32 %v889_v51, %v892_v54 }
 0x3ab   : > { %v894_v56 = vmul.f32 1.442695, %v893_v55 }
 0x3ad   : > { %1415 = vpow2.f32 %v894_v56 }
 0x3b7   : > { %v1416_v57 = vpop.eup %1415 }
 0x3b8   : > { %v896_v58 = vsel %vm807_vm3, %v1416_v57, 0.0 }
 0x3b9   : > { %897 = vadd.xlane.f32.xlu0 %v896_v58 }
 0x446   : > { %v898_v0 = vpop.xlane.xlu0 %897 }
 0x447   : > { %1417 = vrcp.f32 %v898_v0 }
 0x451   : > { %v1418_v1 = vpop.eup %1417 }
 0x452   : > { %v900_v2 = vmul.f32 %v1418_v1, %v1416_v57 }
 0x454   : > { %1314 = vmatmul.mubr.msk.f32.vlgmr.msra.gmra.mrb[4].mxu1 %vm807_vm3, %v900_v2 }
 0x527   : > { %v970_v3 = vpop.f32.mrb[4].mxu1 }
 0x528   : > { %v1315_v4 = vpop.f32.mrb[5].mxu1  ;;  %1319 = vmatmul.mubr.msk.f32.vlgmr.msra.gmra.mrb[4].mxu0 %vm807_vm3, %v970_v3 }
 0x5f8   : > { %1054 = sbr.rel (%p1244_p1) target bundleno = 1543 (0x607), region = 72 }
 0x5fb   : > { %v1044_v6 = vpop.f32.mrb[4].mxu0 }
 0x5fc   : > { %v1049_v7 = vadd.f32 %v1048_v5, %v1044_v6  ;;  %v1320_v8 = vpop.f32.mrb[5].mxu0 }
 0x5fe   : > { %1050 = vst.msk [vmem:[#allocation3] sm:$0xff] %vm571_vm2, %v1049_v7 }
 0x605   : > { %v1055_v9 = vld [vmem:[#allocation3] sm:$0xff] }
 0x606   : > { %1056 = vst.msk [vmem:[%s480_s11] sm:$0xff] %vm571_vm2, %v1055_v9 }
 0x607 PF: > { %s1861_s3 = sld [smem:[#allocation10_spill]]  ;;  %s1864_s19 = sld [smem:[#allocation22_spill]] }
 0x608   : > { %s1862_s21 = sld [smem:[#allocation8_spill]]  ;;  %s1071_s23 = sshll.u32 %s480_s11, 4  ;;  %s1072_s23 = int_to_ptr.vmem [resolvable:$true] %s1071_s23 }
 0x609   : > { %s1419_s4 = scalar_lea.vmem %s1072_s23, 128  ;;  %s1518_s24 = smov [#allocation4]  }
 0x60a   : > { %p1420_p2 = scmp.ne.s32.totalorder %s1072_s23, %s1419_s4  ;;  %s1423_s27 = sshll.u32 %s1518_s24, 4  ;;  %s1424_s27 = int_to_ptr.vmem [resolvable:$false] %s1423_s27 }
 0x60b   : > { %s1425_s17 = scalar_lea.vmem %s1424_s27, 256  ;;  %p1426_p6 = scmp.lt.s32.totalorder %s1072_s23, %s1424_s27 }
 0x60c   : > { %p1421_p4 = pnand %p1420_p2, %p1628_p3  ;;  %p1427_p7 = scmp.lt.s32.totalorder %s1425_s17, %s1419_s4 }
 0x60d   : > { %s1246_s13 = sshll.u32 %s1861_s3, 7  ;;  %s1865_s30 = smov %s1864_s19 }
 0x60e   : > { %s1763_s18 = scalar_lea.hbm %s1864_s19, %s1246_s13  ;;  %s1866_s20 = sand.u32 1, %s1862_s21  }
 0x60f   : > { %s1058_s0 = scalar_lea.sflag [#allocation5], %s1866_s20  ;;  %p1422_p5 = pneg %p1421_p4 }
 0x610   : > { %p1428_p8 = por %p1427_p7, %p1426_p6 }
 0x612   : > { %p1429_p10 = pnand %p1428_p8, %p1422_p5 }
 0x614   : > { %1432 = shalt.err (!%p1429_p10)
}
 0x615   : > { %s1433_s16 = scalar_lea.hbm %s1763_s18, 128  ;;  %s1437_s25 = scalar_lea.hbm %s1865_s30, 256 }
 0x616   : > { %p1434_p11 = scmp.ne.s32.totalorder %s1763_s18, %s1433_s16  ;;  %p1438_p0 = scmp.lt.u32.totalorder %s1763_s18, %s1865_s30 }
 0x617   : > { %p1439_p1 = scmp.lt.u32.totalorder %s1437_s25, %s1433_s16  ;;  %p1441_p4 = scmp.lt.u32.totalorder %s1433_s16, %s1763_s18 }
 0x618   : > { %p1435_p12 = pnand %p1434_p11, %p1628_p3 }
 0x619   : > { %p1440_p2 = por %p1439_p1, %p1438_p0 }
 0x61a   : > { %p1436_p13 = pneg %p1435_p12 }
 0x61b   : > { %p1442_p5 = por %p1441_p4, %p1440_p2 }
 0x61d   : > { %p1443_p6 = pnand %p1442_p5, %p1436_p13 }
 0x61f   : > { %1446 = shalt.err (!%p1443_p6)
}
 0x620   : > { %1339 = dma.vmem_to_hbm [thread:$0]  (%p1628_p3), %s1072_s23, 128, %s1763_s18, %s1058_s0  }
 0x621 PF: > { %s1867_s28 = sld [smem:[#allocation13_spill]]  ;;  %s1868_s3 = sld [smem:[#allocation7_spill]] }
 0x627   : > { %p1345_p7 = scmp.ge.s32.totalorder %s1867_s28, 2  ;;  %s1083_s13 = sand.u32 1, %s1868_s3  }
 0x628   : > { %s1084_s22 = scalar_lea.sflag [#allocation5], %s1083_s13 }
 0x629   : > { %p1342_p8 = pnand %p1345_p7, %p1638_p9 }
 0x62b   : > { %1480 = dma.done.wait (!%p1342_p8), %s1084_s22, 128  }
 0x62c   : > { %1482 = vsyncadd (!%p1342_p8), %s1084_s22, 4294967168  ;;  %s24_s24 = sadd.s32 1, %s1867_s28   ;;  %s1870_s17 = sld [smem:[#allocation8_spill]] }
 0x62d   : > { %p21_p10 = scmp.ge.s32.totalorder %s24_s24, 10   ;;  %s1871_s18 = sld [smem:[#allocation9_spill]] }
 0x62e   : > { %s1872_s19 = sld [smem:[#allocation18_spill]]  ;;  %s1873_s20 = sld [smem:[#allocation11_spill]] }
 0x62f   : > { %s1874_s21 = sld [smem:[#allocation12_spill]]  ;;  %s1875_s22 = sld [smem:[#allocation14_spill]] }
 0x630   : > { %s1876_s23 = sld [smem:[#allocation16_spill]]  ;;  %23 = sbr.rel (!%p21_p10) target bundleno = 10 (0xa), region = 128 }
 0x637   :  { %1089 = vsyncpa [#allocation5], 1 }
 0x638   :  { %1091 = vsyncpa [#allocation5 + $0x1], 1 }

</bundles_post_ra>
